<compile_context>
chip_gen: v5e
topology: v5e:2x2
jax: 0.10.0
libtpu: 0.0.40
codegen_flags: <defaults>
</compile_context>

<pallas_src>
import numpy as np

import jax
import jax.numpy as jnp
from jax.experimental import pallas as pl
from jax.experimental.pallas import tpu as pltpu


# 32 MiB fits under every generation's physical VMEM (v7x: 64 MiB) while
# lifting v5e above its 16 MiB scoped default.
_VMEM_LIMIT_BYTES = 32 * 1024 * 1024


# ---------------------------------------------------------------------------
# Fused CNN forward kernel: 3 convs + 2 FC layers, one image per grid step.
# ---------------------------------------------------------------------------
def _dqn_cnn_kernel(y_ref, wc1_ref, b1_ref, wc2_ref, b2_ref, wc3_ref, b3_ref,
                    wfc1_ref, bfc1_ref, wfc2_ref, bfc2_ref, o_ref):
    f32 = jnp.float32
    bf16 = jnp.bfloat16
    k1 = wc1_ref.shape[1]                      # 64 * Cin

    # ---- conv1: 8x8 stride 4, 84x84xCin -> 20x20x32 (phase-decomposed) ----
    # y_ref block: [1, 11, 11, 64*Cin] = space-to-depth(8) of the padded image.
    # acc1 rows: (i', j') with i', j' in 0..9; cols: 32*(2a+b)+co where (a, b)
    # is the output position's parity (the stride-2 phase conv2 will need).
    acc1 = jnp.zeros((100, 128), f32)
    for mh in range(2):
        for mw in range(2):
            patch = y_ref[0, mh:mh + 10, mw:mw + 10, :]        # [10,10,64*Cin]
            patch = patch.reshape(100, k1)
            acc1 = acc1 + jnp.dot(patch, wc1_ref[2 * mh + mw],
                                  preferred_element_type=f32)
    act1 = jnp.maximum(acc1 + b1_ref[...], 0.0).astype(bf16)   # [100, 128]
    # Split the four stride-2 phases back out: act1_ph[a][b][i', j', c].
    act1_ph = [[act1[:, 32 * (2 * a + b): 32 * (2 * a + b) + 32]
                .reshape(10, 10, 32)
                for b in range(2)] for a in range(2)]

    # ---- conv2: 4x4 stride 2, 20x20x32 -> 9x9x64 ----
    acc2 = jnp.zeros((81, 64), f32)
    for a in range(2):
        for b in range(2):
            for mh in range(2):
                for mw in range(2):
                    idx = ((a * 2 + b) * 2 + mh) * 2 + mw
                    p = act1_ph[a][b][mh:mh + 9, mw:mw + 9, :].reshape(81, 32)
                    acc2 = acc2 + jnp.dot(p, wc2_ref[idx],
                                          preferred_element_type=f32)
    act2 = jnp.maximum(acc2 + b2_ref[...], 0.0).astype(bf16).reshape(9, 9, 64)

    # ---- conv3: 3x3 stride 1, 9x9x64 -> 7x7x64 ----
    acc3 = jnp.zeros((49, 64), f32)
    for kh in range(3):
        for kw in range(3):
            p = act2[kh:kh + 7, kw:kw + 7, :].reshape(49, 64)
            acc3 = acc3 + jnp.dot(p, wc3_ref[kh * 3 + kw],
                                  preferred_element_type=f32)
    feat = jnp.maximum(acc3 + b3_ref[...], 0.0).astype(bf16)    # [49,64] (h,w,c)

    # ---- fc1: 3136 -> 512, ReLU (flatten folded into per-position weights) --
    hidden = bfc1_ref[...]                                      # [1, 512] f32
    for r in range(49):
        hidden = hidden + jnp.dot(feat[r:r + 1, :], wfc1_ref[r],
                                  preferred_element_type=f32)
    hidden = jnp.maximum(hidden, 0.0).astype(bf16)              # [1, 512]

    # ---- fc2: 512 -> num_actions ----
    q = jnp.dot(hidden, wfc2_ref[...], preferred_element_type=f32) + bfc2_ref[...]
    o_ref[...] = q[None].astype(o_ref.dtype)                    # [1, 1, A]


def dqn_cnn_forward(x, kp):
    """x: [B, Cin, 84, 84] (NCHW, PyTorch convention); kp: kernel params."""
    bsz, cin, h, w = x.shape
    assert (h, w) == (84, 84), "CNN branch hard-codes Linear(64*7*7, 512)"
    na = kp["wfc2"].shape[1]
    k1 = 64 * cin

    # Cast first (halves pad/transpose traffic), then space-to-depth by 8:
    # [B, Cin, 84, 84] -> pad to 88 -> [B, 11, 11, 8*8*Cin].  Same byte count
    # as the input -- no duplicated im2col traffic.
    xb = x.astype(jnp.bfloat16)
    xb = jnp.pad(xb, ((0, 0), (0, 0), (0, 4), (0, 4)))
    xb = xb.reshape(bsz, cin, 11, 8, 11, 8).transpose(0, 2, 4, 3, 5, 1)
    y = xb.reshape(bsz, 11, 11, k1)

    flops_per_img = 2 * (4 * 100 * k1 * 128 + 16 * 81 * 32 * 64
                         + 9 * 49 * 64 * 64 + 3136 * 512 + 512 * na)
    wbytes = 2 * (4 * k1 * 128 + 16 * 32 * 64 + 9 * 64 * 64
                  + 49 * 64 * 512 + 512 * na)
    cost = pl.CostEstimate(
        flops=bsz * flops_per_img,
        transcendentals=0,
        bytes_accessed=bsz * (11 * 11 * k1 * 2 + na * 4) + wbytes,
    )

    out = pl.pallas_call(
        _dqn_cnn_kernel,
        out_shape=jax.ShapeDtypeStruct((bsz, 1, na), jnp.float32),
        grid=(bsz,),
        in_specs=[
            pl.BlockSpec((1, 11, 11, k1), lambda i: (i, 0, 0, 0)),  # image
            pl.BlockSpec((4, k1, 128),    lambda i: (0, 0, 0)),     # conv1 W
            pl.BlockSpec((1, 128),        lambda i: (0, 0)),        # conv1 b
            pl.BlockSpec((16, 32, 64),    lambda i: (0, 0, 0)),     # conv2 W
            pl.BlockSpec((1, 64),         lambda i: (0, 0)),        # conv2 b
            pl.BlockSpec((9, 64, 64),     lambda i: (0, 0, 0)),     # conv3 W
            pl.BlockSpec((1, 64),         lambda i: (0, 0)),        # conv3 b
            pl.BlockSpec((49, 64, 512),   lambda i: (0, 0, 0)),     # fc1 W
            pl.BlockSpec((1, 512),        lambda i: (0, 0)),        # fc1 b
            pl.BlockSpec((512, na),       lambda i: (0, 0)),        # fc2 W
            pl.BlockSpec((1, na),         lambda i: (0, 0)),        # fc2 b
        ],
        out_specs=pl.BlockSpec((1, 1, na), lambda i: (i, 0, 0)),
        compiler_params=pltpu.CompilerParams(
            dimension_semantics=("parallel",),
            vmem_limit_bytes=_VMEM_LIMIT_BYTES),
        cost_estimate=cost,
    )(y, kp["wc1"], kp["b1"], kp["wc2"], kp["b2"], kp["wc3"], kp["b3"],
      kp["wfc1"], kp["bfc1"], kp["wfc2"], kp["bfc2"])
    return out.reshape(bsz, na)


# ---------------------------------------------------------------------------
# Fused MLP kernel: Linear(D,128)+ReLU -> Linear(128,128)+ReLU -> Linear(128,A)
# ---------------------------------------------------------------------------
def _mlp_kernel(x_ref, w1_ref, b1_ref, w2_ref, b2_ref, w3_ref, b3_ref, o_ref):
    f32 = jnp.float32
    h = jnp.dot(x_ref[...], w1_ref[...], preferred_element_type=f32)
    h = jnp.maximum(h + b1_ref[...], 0.0).astype(jnp.bfloat16)
    h = jnp.dot(h, w2_ref[...], preferred_element_type=f32)
    h = jnp.maximum(h + b2_ref[...], 0.0).astype(jnp.bfloat16)
    o = jnp.dot(h, w3_ref[...], preferred_element_type=f32) + b3_ref[...]
    o_ref[...] = o.astype(o_ref.dtype)


def pallas_mlp(x, params, *, tile_m=256):
    (w1, b1), (w2, b2), (w3, b3) = params
    m, d = x.shape
    h1, h2, a = w1.shape[1], w2.shape[1], w3.shape[1]
    tm = m if m <= tile_m else tile_m
    grid = (pl.cdiv(m, tm),)
    cost = pl.CostEstimate(
        flops=2 * m * (d * h1 + h1 * h2 + h2 * a),
        transcendentals=0,
        bytes_accessed=2 * (m * d + d * h1 + h1 * h2 + h2 * a) + 4 * m * a,
    )
    return pl.pallas_call(
        _mlp_kernel,
        out_shape=jax.ShapeDtypeStruct((m, a), jnp.float32),
        grid=grid,
        in_specs=[
            pl.BlockSpec((tm, d),  lambda i: (i, 0)),
            pl.BlockSpec((d, h1),  lambda i: (0, 0)),
            pl.BlockSpec((1, h1),  lambda i: (0, 0)),
            pl.BlockSpec((h1, h2), lambda i: (0, 0)),
            pl.BlockSpec((1, h2),  lambda i: (0, 0)),
            pl.BlockSpec((h2, a),  lambda i: (0, 0)),
            pl.BlockSpec((1, a),   lambda i: (0, 0)),
        ],
        out_specs=pl.BlockSpec((tm, a), lambda i: (i, 0)),
        compiler_params=pltpu.CompilerParams(
            dimension_semantics=("parallel",),
            vmem_limit_bytes=_VMEM_LIMIT_BYTES),
        cost_estimate=cost,
    )(x.astype(jnp.bfloat16),
      w1.astype(jnp.bfloat16), b1.astype(jnp.float32).reshape(1, h1),
      w2.astype(jnp.bfloat16), b2.astype(jnp.float32).reshape(1, h2),
      w3.astype(jnp.bfloat16), b3.astype(jnp.float32).reshape(1, a))


# ---------------------------------------------------------------------------
# Weight packing (done once at init, on host, in numpy).
# ---------------------------------------------------------------------------
def _prep_cnn_kernel_params(conv_params, fc_params):
    (w1, b1, _), (w2, b2, _), (w3, b3, _) = conv_params
    w1 = np.asarray(w1, np.float32)          # [32, Cin, 8, 8]
    w2 = np.asarray(w2, np.float32)          # [64, 32, 4, 4]
    w3 = np.asarray(w3, np.float32)          # [64, 64, 3, 3]
    cin = w1.shape[1]
    kdim = 64 * cin

    # conv1: per space-to-depth block (mh, mw), rows t = (rh*8 + rw)*Cin + c
    # (matching the XLA space-to-depth ordering), cols 32*(2a+b)+co.
    wc1 = np.zeros((4, kdim, 128), np.float32)
    for a in range(2):
        for b in range(2):
            col0 = 32 * (2 * a + b)
            for mh in range(2):
                for mw in range(2):
                    blk = 2 * mh + mw
                    for rh in range(8):
                        kh = 8 * mh + rh - 4 * a
                        if not 0 <= kh < 8:
                            continue
                        for rw in range(8):
                            kw = 8 * mw + rw - 4 * b
                            if not 0 <= kw < 8:
                                continue
                            t0 = (rh * 8 + rw) * cin
                            wc1[blk, t0:t0 + cin, col0:col0 + 32] = \
                                w1[:, :, kh, kw].T
    b1c = np.tile(np.asarray(b1, np.float32), 4).reshape(1, 128)

    # conv2: block index ((a*2+b)*2+mh)*2+mw selects kernel tap (2mh+a, 2mw+b).
    wc2 = np.zeros((16, 32, 64), np.float32)
    for a in range(2):
        for b in range(2):
            for mh in range(2):
                for mw in range(2):
                    idx = ((a * 2 + b) * 2 + mh) * 2 + mw
                    wc2[idx] = w2[:, :, 2 * mh + a, 2 * mw + b].T
    # conv3: one [Cin, Cout] block per kernel tap.
    wc3 = np.zeros((9, 64, 64), np.float32)
    for kh in range(3):
        for kw in range(3):
            wc3[kh * 3 + kw] = w3[:, :, kh, kw].T

    # fc1: fold PyTorch's NCHW Flatten (c, h, w) into the weight rows, then
    # group by spatial position (h, w) -> 49 blocks of [64, 512].
    (wf1, bf1), (wf2, bf2) = fc_params
    wf1 = np.asarray(wf1, np.float32)                         # [3136, 512]
    wf1_blocks = (wf1.reshape(64, 7, 7, 512)
                  .transpose(1, 2, 0, 3)
                  .reshape(49, 64, 512))

    bf16 = jnp.bfloat16
    return {
        "wc1": jnp.asarray(wc1, bf16),
        "b1": jnp.asarray(b1c, jnp.float32),
        "wc2": jnp.asarray(wc2, bf16),
        "b2": jnp.asarray(np.asarray(b2, np.float32).reshape(1, 64)),
        "wc3": jnp.asarray(wc3, bf16),
        "b3": jnp.asarray(np.asarray(b3, np.float32).reshape(1, 64)),
        "wfc1": jnp.asarray(wf1_blocks, bf16),
        "bfc1": jnp.asarray(np.asarray(bf1, np.float32).reshape(1, 512)),
        "wfc2": jnp.asarray(np.asarray(wf2, np.float32), bf16),
        "bfc2": jnp.asarray(np.asarray(bf2, np.float32).reshape(1, -1)),
    }


# ---------------------------------------------------------------------------
# DQN module (mirrors the PyTorch __init__ branching)
# ---------------------------------------------------------------------------
def _uniform_init(key, shape, fan_in):
    bound = 1.0 / float(np.sqrt(fan_in))       # PyTorch default init
    return jax.random.uniform(key, shape, jnp.float32, -bound, bound)


class DQN:
    def __init__(self, num_actions, input_shape, key):
        self.input_shape = tuple(input_shape)
        self.num_actions = num_actions

        if len(input_shape) == 1:
            dims = [(input_shape[0], 128), (128, 128), (128, num_actions)]
            self.params = []
            for fi, fo in dims:
                key, kw, kb = jax.random.split(key, 3)
                self.params.append((_uniform_init(kw, (fi, fo), fi),
                                    _uniform_init(kb, (fo,), fi)))
            return

        c_in = input_shape[0]
        conv_cfg = [(c_in, 32, 8, 4), (32, 64, 4, 2), (64, 64, 3, 1)]
        self.conv_params = []           # PyTorch layout [Cout,Cin,k,k] f32
        for cin, cout, k, s in conv_cfg:
            key, kw, kb = jax.random.split(key, 3)
            fan_in = cin * k * k
            w = _uniform_init(kw, (cout, cin, k, k), fan_in)
            b = _uniform_init(kb, (cout,), fan_in)
            self.conv_params.append((w, b, s))

        fc_cfg = [(64 * 7 * 7, 512), (512, num_actions)]
        self.fc_params = []             # f32, PyTorch (NCHW-flatten) semantics
        for fi, fo in fc_cfg:
            key, kw, kb = jax.random.split(key, 3)
            self.fc_params.append((_uniform_init(kw, (fi, fo), fi),
                                   _uniform_init(kb, (fo,), fi)))

        # Pack everything into the fused-kernel layout once.
        self.kernel_params = _prep_cnn_kernel_params(self.conv_params,
                                                     self.fc_params)

    def forward(self, x):
        if len(self.input_shape) == 1:
            return pallas_mlp(x, self.params)
        return dqn_cnn_forward(x, self.kernel_params)


# ---------------------------------------------------------------------------
# Pure-JAX f32 references (PyTorch semantics) for the correctness check
# ---------------------------------------------------------------------------
_HI = jax.lax.Precision.HIGHEST


def _reference_mlp(x, params):
    (w1, b1), (w2, b2), (w3, b3) = params
    h = jnp.maximum(jnp.dot(x, w1, precision=_HI) + b1, 0.0)
    h = jnp.maximum(jnp.dot(h, w2, precision=_HI) + b2, 0.0)
    return jnp.dot(h, w3, precision=_HI) + b3


def _reference_cnn(x, conv_params, fc_params):
    for w, b, s in conv_params:
        x = jax.lax.conv_general_dilated(
            x, w, (s, s), "VALID",
            dimension_numbers=("NCHW", "OIHW", "NCHW"), precision=_HI)
        x = jnp.maximum(x + b.reshape(1, -1, 1, 1), 0.0)
    x = x.reshape(x.shape[0], -1)               # NCHW flatten (PyTorch order)
    (w1, b1), (w2, b2) = fc_params
    h = jnp.maximum(jnp.dot(x, w1, precision=_HI) + b1, 0.0)
    return jnp.dot(h, w2, precision=_HI) + b2


# ---------------------------------------------------------------------------
if __name__ == "__main__":
    key = jax.random.PRNGKey(0)
    key, k_mlp, k_cnn, kx1, kx2 = jax.random.split(key, 5)

    # --- MLP branch: state dim 8, 4 actions, batch 2 ---
    mlp_net = DQN(num_actions=4, input_shape=(8,), key=k_mlp)
    x_mlp = jax.random.normal(kx1, (2, 8), jnp.float32)
    q_mlp = jax.block_until_ready(jax.jit(mlp_net.forward)(x_mlp))
    assert q_mlp.shape == (2, 4), q_mlp.shape
    ref_mlp = _reference_mlp(x_mlp, mlp_net.params)
    np.testing.assert_allclose(np.asarray(q_mlp), np.asarray(ref_mlp),
                               rtol=5e-2, atol=5e-3)

    # --- CNN branch: Atari-style 4x84x84 (Linear(64*7*7,512) hard-codes
    #     84x84), 6 actions, batch 2 ---
    cnn_net = DQN(num_actions=6, input_shape=(4, 84, 84), key=k_cnn)
    x_cnn = jax.random.normal(kx2, (2, 4, 84, 84), jnp.float32)
    q_cnn = jax.block_until_ready(jax.jit(cnn_net.forward)(x_cnn))
    assert q_cnn.shape == (2, 6), q_cnn.shape
    ref_cnn = _reference_cnn(x_cnn, cnn_net.conv_params, cnn_net.fc_params)
    np.testing.assert_allclose(np.asarray(q_cnn), np.asarray(ref_cnn),
                               rtol=5e-2, atol=5e-3)

    print("KERNEL_OK")
</pallas_src>

<mosaic_0001>
module attributes {stable_mosaic.version = 11 : i64} {
  func.func @_mlp_kernel(%arg0: i32, %arg1: memref<2x8xbf16, #tpu.memory_space<vmem>>, %arg2: memref<8x128xbf16, #tpu.memory_space<vmem>>, %arg3: memref<1x128xf32, #tpu.memory_space<vmem>>, %arg4: memref<128x128xbf16, #tpu.memory_space<vmem>>, %arg5: memref<1x128xf32, #tpu.memory_space<vmem>>, %arg6: memref<128x4xbf16, #tpu.memory_space<vmem>>, %arg7: memref<1x4xf32, #tpu.memory_space<vmem>>, %arg8: memref<2x4xf32, #tpu.memory_space<vmem>>) attributes {dimension_semantics = [#tpu.dimension_semantics<parallel>], iteration_bounds = array<i64: 1>, scalar_prefetch = 0 : i64, scratch_operands = 0 : i64, tpu.core_type = #tpu.core_type<tc>, window_params = [{transform_indices = @transform_0, window_bounds = array<i64: 2, 8>}, {pipeline_mode = #tpu.pipeline_mode<synchronous>, transform_indices = @transform_1, window_bounds = array<i64: 8, 128>}, {pipeline_mode = #tpu.pipeline_mode<synchronous>, transform_indices = @transform_2, window_bounds = array<i64: 1, 128>}, {pipeline_mode = #tpu.pipeline_mode<synchronous>, transform_indices = @transform_3, window_bounds = array<i64: 128, 128>}, {pipeline_mode = #tpu.pipeline_mode<synchronous>, transform_indices = @transform_4, window_bounds = array<i64: 1, 128>}, {pipeline_mode = #tpu.pipeline_mode<synchronous>, transform_indices = @transform_5, window_bounds = array<i64: 128, 4>}, {pipeline_mode = #tpu.pipeline_mode<synchronous>, transform_indices = @transform_6, window_bounds = array<i64: 1, 4>}, {transform_indices = @transform_7, window_bounds = array<i64: 2, 4>}]} {
    %c0 = arith.constant 0 : index
    %c0_0 = arith.constant 0 : index
    %0 = vector.load %arg1[%c0, %c0_0] : memref<2x8xbf16, #tpu.memory_space<vmem>>, vector<2x8xbf16>
    %c0_1 = arith.constant 0 : index
    %c0_2 = arith.constant 0 : index
    %1 = vector.load %arg2[%c0_1, %c0_2] : memref<8x128xbf16, #tpu.memory_space<vmem>>, vector<8x128xbf16>
    %cst = arith.constant dense<0.000000e+00> : vector<2x128xf32>
    %2 = tpu.matmul %0, %1, %cst {dimension_numbers = #tpu.dot_dimension_numbers<[1], [0], [0], [1], [0, 0, 1, 1], [], []>} : vector<2x8xbf16>, vector<8x128xbf16>, vector<2x128xf32> -> vector<2x128xf32>
    %c0_3 = arith.constant 0 : index
    %c0_4 = arith.constant 0 : index
    %3 = vector.load %arg3[%c0_3, %c0_4] : memref<1x128xf32, #tpu.memory_space<vmem>>, vector<1x128xf32>
    %4 = vector.broadcast %3 : vector<1x128xf32> to vector<2x128xf32>
    %5 = arith.addf %2, %4 : vector<2x128xf32>
    %cst_5 = arith.constant 0.000000e+00 : f32
    %6 = vector.broadcast %cst_5 : f32 to vector<2x128xf32>
    %7 = arith.maximumf %5, %6 : vector<2x128xf32>
    %8 = arith.truncf %7 : vector<2x128xf32> to vector<2x128xbf16>
    %c0_6 = arith.constant 0 : index
    %c0_7 = arith.constant 0 : index
    %9 = vector.load %arg4[%c0_6, %c0_7] : memref<128x128xbf16, #tpu.memory_space<vmem>>, vector<128x128xbf16>
    %cst_8 = arith.constant dense<0.000000e+00> : vector<2x128xf32>
    %10 = tpu.matmul %8, %9, %cst_8 {dimension_numbers = #tpu.dot_dimension_numbers<[1], [0], [0], [1], [0, 0, 1, 1], [], []>} : vector<2x128xbf16>, vector<128x128xbf16>, vector<2x128xf32> -> vector<2x128xf32>
    %c0_9 = arith.constant 0 : index
    %c0_10 = arith.constant 0 : index
    %11 = vector.load %arg5[%c0_9, %c0_10] : memref<1x128xf32, #tpu.memory_space<vmem>>, vector<1x128xf32>
    %12 = vector.broadcast %11 : vector<1x128xf32> to vector<2x128xf32>
    %13 = arith.addf %10, %12 : vector<2x128xf32>
    %cst_11 = arith.constant 0.000000e+00 : f32
    %14 = vector.broadcast %cst_11 : f32 to vector<2x128xf32>
    %15 = arith.maximumf %13, %14 : vector<2x128xf32>
    %16 = arith.truncf %15 : vector<2x128xf32> to vector<2x128xbf16>
    %c0_12 = arith.constant 0 : index
    %c0_13 = arith.constant 0 : index
    %17 = vector.load %arg6[%c0_12, %c0_13] : memref<128x4xbf16, #tpu.memory_space<vmem>>, vector<128x4xbf16>
    %cst_14 = arith.constant dense<0.000000e+00> : vector<2x4xf32>
    %18 = tpu.matmul %16, %17, %cst_14 {dimension_numbers = #tpu.dot_dimension_numbers<[1], [0], [0], [1], [0, 0, 1, 1], [], []>} : vector<2x128xbf16>, vector<128x4xbf16>, vector<2x4xf32> -> vector<2x4xf32>
    %c0_15 = arith.constant 0 : index
    %c0_16 = arith.constant 0 : index
    %19 = vector.load %arg7[%c0_15, %c0_16] : memref<1x4xf32, #tpu.memory_space<vmem>>, vector<1x4xf32>
    %20 = vector.broadcast %19 : vector<1x4xf32> to vector<2x4xf32>
    %21 = arith.addf %18, %20 : vector<2x4xf32>
    %c0_17 = arith.constant 0 : index
    %c0_18 = arith.constant 0 : index
    %22 = vector.load %arg8[%c0_17, %c0_18] : memref<2x4xf32, #tpu.memory_space<vmem>>, vector<2x4xf32>
    tpu.vector_store %arg8[%c0_17, %c0_18], %21 {strides = array<i32>} : memref<2x4xf32, #tpu.memory_space<vmem>>, vector<2x4xf32>,
    return
  }
  func.func @transform_0(%arg0: i32) -> (i32, i32) {
    %c0_i32 = arith.constant 0 : i32
    %c0_i32_0 = arith.constant 0 : i32
    return %arg0, %c0_i32 : i32, i32
  }
  func.func @transform_1(%arg0: i32) -> (i32, i32) {
    %c0_i32 = arith.constant 0 : i32
    %c0_i32_0 = arith.constant 0 : i32
    %c0_i32_1 = arith.constant 0 : i32
    return %c0_i32, %c0_i32_0 : i32, i32
  }
  func.func @transform_2(%arg0: i32) -> (i32, i32) {
    %c0_i32 = arith.constant 0 : i32
    %c0_i32_0 = arith.constant 0 : i32
    %c0_i32_1 = arith.constant 0 : i32
    return %c0_i32, %c0_i32_0 : i32, i32
  }
  func.func @transform_3(%arg0: i32) -> (i32, i32) {
    %c0_i32 = arith.constant 0 : i32
    %c0_i32_0 = arith.constant 0 : i32
    %c0_i32_1 = arith.constant 0 : i32
    return %c0_i32, %c0_i32_0 : i32, i32
  }
  func.func @transform_4(%arg0: i32) -> (i32, i32) {
    %c0_i32 = arith.constant 0 : i32
    %c0_i32_0 = arith.constant 0 : i32
    %c0_i32_1 = arith.constant 0 : i32
    return %c0_i32, %c0_i32_0 : i32, i32
  }
  func.func @transform_5(%arg0: i32) -> (i32, i32) {
    %c0_i32 = arith.constant 0 : i32
    %c0_i32_0 = arith.constant 0 : i32
    %c0_i32_1 = arith.constant 0 : i32
    return %c0_i32, %c0_i32_0 : i32, i32
  }
  func.func @transform_6(%arg0: i32) -> (i32, i32) {
    %c0_i32 = arith.constant 0 : i32
    %c0_i32_0 = arith.constant 0 : i32
    %c0_i32_1 = arith.constant 0 : i32
    return %c0_i32, %c0_i32_0 : i32, i32
  }
  func.func @transform_7(%arg0: i32) -> (i32, i32) {
    %c0_i32 = arith.constant 0 : i32
    %c0_i32_0 = arith.constant 0 : i32
    return %arg0, %c0_i32 : i32, i32
  }
}

</mosaic_0001>

<bundles_post_ra>
// kernel: forward.1
= control target key start
LH: loop header
LB: loop body
LE: loop exit
PB: predicated region body
PF: predicated region fallthrough
CT: control target
= control target key end

     0   :  { %12 = vsyncpa [#allocation3], 0  ;;  %s509_s0 = inlined_call_operand.vmem [shape: bf16[2,8], index: 0, kind: input, shape index: {}]   ;;  %s510_s1 = inlined_call_operand.vmem [shape: bf16[8,128], index: 1, kind: input, shape index: {}]   ;;  %s511_s2 = inlined_call_operand.vmem [shape: f32[1,128], index: 2, kind: input, shape index: {}]   ;;  %s512_s3 = inlined_call_operand.hbm [shape: bf16[128,128], index: 3, kind: input, shape index: {}]   ;;  %s513_s4 = inlined_call_operand.vmem [shape: f32[1,128], index: 4, kind: input, shape index: {}]   ;;  %s514_s5 = inlined_call_operand.hbm [shape: bf16[128,4], index: 5, kind: input, shape index: {}]   ;;  %s515_s6 = inlined_call_operand.vmem [shape: f32[1,4], index: 6, kind: input, shape index: {}]   ;;  %s516_s7 = inlined_call_operand.hbm [shape: f32[2,4], index: 7, kind: output, shape index: {}]  }
   0x1   :  { %13 = vsyncpa [#allocation6], 0 }
   0x2   :  { %14 = vsyncpa [#allocation4], 0  ;;  %s25_s26 = sshll.u32 %s512_s3, 4  ;;  %s440_s27 = smov [#allocation2]   ;;  %s26_s26 = int_to_ptr.hbm [resolvable:$true] %s25_s26 }
   0x3   :  { %s27_s28 = sshll.u32 %s440_s27, 4  ;;  %s40_s8 = sshll.u32 %s514_s5, 4  ;;  %s28_s28 = int_to_ptr.vmem [resolvable:$true] %s27_s28  ;;  %s41_s8 = int_to_ptr.hbm [resolvable:$true] %s40_s8 }
   0x4   :  { %s441_s9 = smov 64   ;;  %s442_s10 = smov 4  }
   0x5   :  { %33 = dma.hbm_to_vmem [thread:$0]  %s26_s26, 1024, %s28_s28, [#allocation3], %s441_s9, %s441_s9, %s442_s10  }
   0x6   :  { %s443_s11 = smov [#allocation5]  }
   0x7   :  { %s42_s12 = sshll.u32 %s443_s11, 4  ;;  %s43_s12 = int_to_ptr.vmem [resolvable:$true] %s42_s12 }
   0x8   :  { %48 = dma.hbm_to_vmem [thread:$0]  %s41_s8, 1024, %s43_s12, [#allocation6], %s441_s9, %s441_s9, %s442_s10  }
   0x9   :  { %434 = dma.done.wait [#allocation3], 1024  }
   0xa   :  { %435 = vsyncadd [#allocation3], 4294966272 }
   0xb   :  { %436 = dma.done.wait [#allocation6], 1024  }
   0xc   :  { %437 = vsyncadd [#allocation6], 4294966272  ;;  %vm70_vm0 = vcmask 1043456   ;;  %v61_v0 = vld [vmem:[%s510_s1] sm:$0xf]  ;;  %vm66_vm1 = vcmask 64512  }
   0xd   :  { %v345_v1 = vld [vmem:[#allocation2 + $0x38] sm:$0xff]  ;;  %v72_v2 = vsel %vm70_vm0, %v61_v0, 0  ;;  %v344_v4 = vld [vmem:[#allocation2 + $0x30] sm:$0xff]  ;;  %v343_v5 = vld [vmem:[#allocation2 + $0x28] sm:$0xff]  ;;  %s444_s18 = smov [#allocation7]   ;;  %s262_s22 = sshll.u32 %s516_s7, 4  ;;  %s263_s22 = int_to_ptr.hbm [resolvable:$true] %s262_s22 }
   0xe   :  { %81 = vmatpush.bf16.msra.mxu0 %v72_v2  ;;  %v60_v3 = vld [vmem:[%s509_s0] sm:$0x1]  ;;  %157 = vmatpush.bf16.msra.mxu1 %v345_v1  ;;  %v342_v6 = vld [vmem:[#allocation2 + $0x20] sm:$0xff]  ;;  %v340_v8 = vld [vmem:[#allocation2 + $0x10] sm:$0xff]  ;;  %s260_s19 = sshll.u32 %s444_s18, 4  ;;  %vm253_vm2 = vcmask 25600   ;;  %s261_s19 = int_to_ptr.vmem [resolvable:$true] %s260_s19 }
   0xf   :  { %v341_v7 = vld [vmem:[#allocation2 + $0x18] sm:$0xff]  ;;  %v339_v9 = vld [vmem:[#allocation2 + $0x8] sm:$0xff]  ;;  %v338_v10 = vld [vmem:[#allocation2] sm:$0xff] }
  0x10   :  { %v353_v11 = vld [vmem:[#allocation5 + $0x38] sm:$0xff]  ;;  %v352_v12 = vld [vmem:[#allocation5 + $0x30] sm:$0xff]  ;;  %v351_v13 = vld [vmem:[#allocation5 + $0x28] sm:$0xff] }
  0x11   :  { %273 = vmatmul.msk.bf16.vlgmr.msra.gmra.mxu0 %vm66_vm1, %v60_v3  ;;  %240 = vmatpush.bf16.msra.mxu2 %v353_v11  ;;  %v350_v14 = vld [vmem:[#allocation5 + $0x20] sm:$0xff]  ;;  %v349_v15 = vld [vmem:[#allocation5 + $0x18] sm:$0xff]  ;;  %v348_v16 = vld [vmem:[#allocation5 + $0x10] sm:$0xff] }
  0x12   :  { %158 = vmatpush.bf16.msra.mxu1 %v344_v4  ;;  %v359_v17 = vld [vmem:[%s511_s2] ss:$0 sm:$0xff]  ;;  %v347_v23 = vld [vmem:[#allocation5 + $0x8] sm:$0xff]  ;;  %v346_v24 = vld [vmem:[#allocation5] sm:$0xff] }
  0x13   :  { %v360_v25 = vld [vmem:[%s513_s4] ss:$0 sm:$0xff] }
  0x14   :  { %v361_v31 = vld [vmem:[%s515_s6] ss:$0 sm:$0xff] }
  0x15   :  { %241 = vmatpush.bf16.msra.mxu2 %v352_v12 }
  0x16   :  { %159 = vmatpush.bf16.msra.mxu1 %v343_v5 }
  0x19   :  { %242 = vmatpush.bf16.msra.mxu2 %v351_v13 }
  0x1a   :  { %160 = vmatpush.bf16.msra.mxu1 %v342_v6 }
  0x1d   :  { %243 = vmatpush.bf16.msra.mxu2 %v350_v14 }
  0x1e   :  { %161 = vmatpush.bf16.msra.mxu1 %v341_v7 }
  0x21   :  { %244 = vmatpush.bf16.msra.mxu2 %v349_v15 }
  0x22   :  { %162 = vmatpush.bf16.msra.mxu1 %v340_v8 }
  0x25   :  { %245 = vmatpush.bf16.msra.mxu2 %v348_v16 }
  0x26   :  { %163 = vmatpush.bf16.msra.mxu1 %v339_v9 }
  0x29   :  { %246 = vmatpush.bf16.msra.mxu2 %v347_v23 }
  0x2a   :  { %164 = vmatpush.bf16.msra.mxu1 %v338_v10 }
  0x2d   :  { %247 = vmatpush.bf16.msra.mxu2 %v346_v24 }
  0x8e   :  { %v83_v18 = vpop.f32.mrf.mxu0 }
  0x8f   :  { %v84_v19 = vadd.f32 %v359_v17, %v83_v18 }
  0x91   :  { %v87_v20 = vmax.f32 %v84_v19, 0.0 }
  0x93   :  { %v88_v21 = vpack.c.bf16 %v87_v20, %v87_v20 }
  0x95   :  { %165 = vmatmul.bf16.vlgmr.msra.gmra.mxu1 %v88_v21 }
  0x96   :  { %v85_v22 = vpop.f32.mrf.mxu0 }
 0x112   :  { %v166_v26 = vpop.f32.mrf.mxu1 }
 0x113   :  { %v167_v27 = vadd.f32 %v360_v25, %v166_v26 }
 0x115   :  { %v170_v28 = vmax.f32 %v167_v27, 0.0 }
 0x117   :  { %v171_v29 = vpack.c.bf16 %v170_v28, %v170_v28 }
 0x119   :  { %248 = vmatmul.bf16.vlgmr.msra.gmra.mxu2 %v171_v29 }
 0x11a   :  { %v168_v30 = vpop.f32.mrf.mxu1 }
 0x19c   :  { %v249_v32 = vpop.f32.mrf.mxu2 }
 0x19d   :  { %v250_v33 = vadd.f32 %v361_v31, %v249_v32 }
 0x19f   :  { %254 = vst.msk [vmem:[#allocation7] sm:$0x3] %vm253_vm2, %v250_v33 }
 0x1a0   :  { %265 = dma.vmem_to_hbm [thread:$0]  %s261_s19, 32, %s263_s22, [#allocation4]  }
 0x1a4   :  { %v251_v34 = vpop.f32.mrf.mxu2 }
 0x1a5   :  { %438 = dma.done.wait [#allocation4], 32  }
 0x1a6   :  { %439 = vsyncadd [#allocation4], 4294967264 }
 0x1a7   :  { %270 = vsyncpa [#allocation3], 1 }
 0x1a8   :  { %271 = vsyncpa [#allocation6], 1 }
 0x1a9   :  { %272 = vsyncpa [#allocation4], 1 }

</bundles_post_ra>
